<compile_context>
chip_gen: v6e
topology: v6e:2x2x1
jax: 0.10.0
libtpu: 0.0.40
codegen_flags: <defaults>
</compile_context>

<pallas_src>
import functools

import jax
import jax.numpy as jnp
from jax.experimental import pallas as pl
from jax.experimental.pallas import tpu as pltpu


def _round_up(x, m):
    return ((x + m - 1) // m) * m


def _choose_batch_tile(b8, tb_max, min_tile=512):
    """Return (TB, B_pad) for a batch already rounded up to a multiple of 8.

    Prefers the largest tile <= tb_max that divides b8 exactly (zero padding)
    while leaving >= 2 grid steps when b8 >= 16 (keeps both v7x TensorCores
    busy). Falls back to padding up to a multiple of tb_max only when exact
    tiling of a large batch would force tiny tiles, where the ~0.35 us
    per-grid-step overhead would dominate the DMA time it is meant to hide.
    """
    tb_max = max(8, (tb_max // 8) * 8)
    upper = b8 if b8 < 16 else (b8 // 2 // 8) * 8   # >= 2 steps when possible
    upper = max(8, min(tb_max, upper))
    tb = upper
    while tb > 8 and b8 % tb:
        tb -= 8
    if b8 % tb == 0 and (tb >= min_tile or b8 <= max(4096, 2 * tb_max)):
        return tb, b8
    # Pathological batch (e.g. 8 * large prime): bounded padding beats a huge
    # number of tiny grid steps.
    return tb_max, _round_up(b8, tb_max)


def globalnet_kernel(fc1_ref, fc2_ref, w1_ref, w2_ref, b_ref, out_ref):
    # fc1_ref: (TB, D1) f32, fc2_ref: (TB, D2) f32   (cast to bf16 on the VPU)
    # w1_ref:  (D1, H)  bf16, w2_ref:  (D2, H) bf16, b_ref: (1, H) f32
    # out_ref: (TB, H)  out_dtype
    acc = jnp.dot(fc1_ref[...].astype(jnp.bfloat16), w1_ref[...],
                  preferred_element_type=jnp.float32)
    acc = acc + jnp.dot(fc2_ref[...].astype(jnp.bfloat16), w2_ref[...],
                        preferred_element_type=jnp.float32)
    acc = acc + b_ref[...]                      # (1, H) broadcast, f32
    out_ref[...] = acc.astype(out_ref.dtype)


def prepare_params(weight, bias, d1):
    """One-time weight prep (hoisted out of the hot path).

    weight: (H, D1 + D2) float32  (PyTorch nn.Linear layout)
    bias:   (H,)         float32
    Returns w1 (D1, H) bf16, w2 (D2, H) bf16, b2 (1, H) f32.
    """
    H = weight.shape[0]
    w1 = jnp.transpose(weight[:, :d1]).astype(jnp.bfloat16)
    w2 = jnp.transpose(weight[:, d1:]).astype(jnp.bfloat16)
    b2 = bias.reshape(1, H).astype(jnp.float32)
    return w1, w2, b2


@functools.partial(jax.jit, static_argnames=("tb_max", "out_dtype"))
def globalnet_forward(fc1, fc2, w1, w2, b2, *, tb_max=2048,
                      out_dtype=jnp.float32):
    """Equivalent of GlobalNet.forward: Linear(cat(fc1, fc2, -1)).

    fc1: (B, D1) float32, fc2: (B, D2) float32
    w1:  (D1, H) bf16,    w2:  (D2, H) bf16,    b2: (1, H) f32
    returns (B, H) out_dtype (default float32, matching the PyTorch module).
    """
    B, D1 = fc1.shape
    D2 = fc2.shape[1]
    H = w1.shape[1]
    out_itemsize = jnp.dtype(out_dtype).itemsize

    b8 = _round_up(B, 8)                        # sublane alignment only
    TB, B_pad = _choose_batch_tile(b8, tb_max)
    if B_pad != B:
        pad = B_pad - B                         # usually <= 7 rows
        fc1 = jnp.pad(fc1, ((0, pad), (0, 0)))
        fc2 = jnp.pad(fc2, ((0, pad), (0, 0)))

    cost = pl.CostEstimate(
        flops=2 * B_pad * (D1 + D2) * H,
        transcendentals=0,
        bytes_accessed=(B_pad * (D1 + D2) * 4          # f32 activations (read once)
                        + (D1 + D2) * H * 2            # bf16 weights (resident)
                        + H * 4                        # f32 bias
                        + B_pad * H * out_itemsize),   # output
    )

    # Double-buffered batch tiles + resident weights/bias. Keep the limit at
    # or above every chip's scoped-VMEM default (16/32/32 MiB) but below v7x's
    # 64 MiB physical capacity.
    vmem_need = (2 * (TB * D1 * 4 + TB * D2 * 4 + TB * H * out_itemsize)
                 + (D1 + D2) * H * 2 + 2 * H * 4)
    vmem_limit = min(48 << 20, max(32 << 20, vmem_need + (8 << 20)))

    out = pl.pallas_call(
        globalnet_kernel,
        out_shape=jax.ShapeDtypeStruct((B_pad, H), out_dtype),
        grid_spec=pl.GridSpec(
            grid=(B_pad // TB,),
            in_specs=[
                pl.BlockSpec((TB, D1), lambda i: (i, 0)),   # batch-tiled f32
                pl.BlockSpec((TB, D2), lambda i: (i, 0)),   # batch-tiled f32
                pl.BlockSpec((D1, H), lambda i: (0, 0)),    # resident weight
                pl.BlockSpec((D2, H), lambda i: (0, 0)),    # resident weight
                pl.BlockSpec((1, H), lambda i: (0, 0)),     # resident bias
            ],
            out_specs=pl.BlockSpec((TB, H), lambda i: (i, 0)),
        ),
        compiler_params=pltpu.CompilerParams(
            dimension_semantics=("parallel",),              # 2 TCs on v7x
            vmem_limit_bytes=vmem_limit),
        cost_estimate=cost,
    )(fc1, fc2, w1, w2, b2)

    if B_pad != B:
        out = out[:B]
    return out


def init_params(key, in_features=256, out_features=128):
    """Deterministic init mimicking nn.Linear default (uniform +/- 1/sqrt(fan_in))."""
    kw, kb = jax.random.split(key)
    bound = 1.0 / (in_features ** 0.5)
    weight = jax.random.uniform(
        kw, (out_features, in_features), jnp.float32, -bound, bound)
    bias = jax.random.uniform(
        kb, (out_features,), jnp.float32, -bound, bound)
    return weight, bias


if __name__ == "__main__":
    key = jax.random.PRNGKey(0)
    k1, k2, kp = jax.random.split(key, 3)

    # fc1/fc2 each 128-wide -> concat 256 -> Linear(256, 128)
    B, D1, D2, H = 8, 128, 128, 128
    fc1 = jax.random.normal(k1, (B, D1), jnp.float32)
    fc2 = jax.random.normal(k2, (B, D2), jnp.float32)
    weight, bias = init_params(kp, in_features=D1 + D2, out_features=H)

    # One-time param prep (split/transpose/cast hoisted out of the hot path).
    w1, w2, b2 = prepare_params(weight, bias, D1)

    out = globalnet_forward(fc1, fc2, w1, w2, b2)
    out = jax.block_until_ready(out)

    # Reference check in plain JAX (same semantics as the PyTorch module).
    # Tolerance accounts for bf16 MXU inputs with f32 accumulation.
    ref = jnp.concatenate((fc1, fc2), axis=-1) @ weight.T + bias
    assert out.shape == (B, H)
    assert out.dtype == jnp.float32
    assert jnp.allclose(out, ref, atol=2e-2, rtol=2e-2)

    print("KERNEL_OK")
</pallas_src>

<mosaic_0001>
module attributes {stable_mosaic.version = 11 : i64} {
  func.func @globalnet_kernel(%arg0: i32, %arg1: memref<8x128xf32, #tpu.memory_space<vmem>>, %arg2: memref<8x128xf32, #tpu.memory_space<vmem>>, %arg3: memref<128x128xbf16, #tpu.memory_space<vmem>>, %arg4: memref<128x128xbf16, #tpu.memory_space<vmem>>, %arg5: memref<1x128xf32, #tpu.memory_space<vmem>>, %arg6: memref<8x128xf32, #tpu.memory_space<vmem>>) attributes {dimension_semantics = [#tpu.dimension_semantics<parallel>], iteration_bounds = array<i64: 1>, scalar_prefetch = 0 : i64, scratch_operands = 0 : i64, tpu.core_type = #tpu.core_type<tc>, window_params = [{transform_indices = @transform_0, window_bounds = array<i64: 8, 128>}, {transform_indices = @transform_1, window_bounds = array<i64: 8, 128>}, {pipeline_mode = #tpu.pipeline_mode<synchronous>, transform_indices = @transform_2, window_bounds = array<i64: 128, 128>}, {pipeline_mode = #tpu.pipeline_mode<synchronous>, transform_indices = @transform_3, window_bounds = array<i64: 128, 128>}, {pipeline_mode = #tpu.pipeline_mode<synchronous>, transform_indices = @transform_4, window_bounds = array<i64: 1, 128>}, {transform_indices = @transform_5, window_bounds = array<i64: 8, 128>}]} {
    %c0 = arith.constant 0 : index
    %c0_0 = arith.constant 0 : index
    %0 = vector.load %arg1[%c0, %c0_0] : memref<8x128xf32, #tpu.memory_space<vmem>>, vector<8x128xf32>
    %1 = arith.truncf %0 : vector<8x128xf32> to vector<8x128xbf16>
    %c0_1 = arith.constant 0 : index
    %c0_2 = arith.constant 0 : index
    %2 = vector.load %arg3[%c0_1, %c0_2] : memref<128x128xbf16, #tpu.memory_space<vmem>>, vector<128x128xbf16>
    %cst = arith.constant dense<0.000000e+00> : vector<8x128xf32>
    %3 = tpu.matmul %1, %2, %cst {dimension_numbers = #tpu.dot_dimension_numbers<[1], [0], [0], [1], [0, 0, 1, 1], [], []>} : vector<8x128xbf16>, vector<128x128xbf16>, vector<8x128xf32> -> vector<8x128xf32>
    %c0_3 = arith.constant 0 : index
    %c0_4 = arith.constant 0 : index
    %4 = vector.load %arg2[%c0_3, %c0_4] : memref<8x128xf32, #tpu.memory_space<vmem>>, vector<8x128xf32>
    %5 = arith.truncf %4 : vector<8x128xf32> to vector<8x128xbf16>
    %c0_5 = arith.constant 0 : index
    %c0_6 = arith.constant 0 : index
    %6 = vector.load %arg4[%c0_5, %c0_6] : memref<128x128xbf16, #tpu.memory_space<vmem>>, vector<128x128xbf16>
    %cst_7 = arith.constant dense<0.000000e+00> : vector<8x128xf32>
    %7 = tpu.matmul %5, %6, %cst_7 {dimension_numbers = #tpu.dot_dimension_numbers<[1], [0], [0], [1], [0, 0, 1, 1], [], []>} : vector<8x128xbf16>, vector<128x128xbf16>, vector<8x128xf32> -> vector<8x128xf32>
    %8 = arith.addf %3, %7 : vector<8x128xf32>
    %c0_8 = arith.constant 0 : index
    %c0_9 = arith.constant 0 : index
    %9 = vector.load %arg5[%c0_8, %c0_9] : memref<1x128xf32, #tpu.memory_space<vmem>>, vector<1x128xf32>
    %10 = vector.broadcast %9 : vector<1x128xf32> to vector<8x128xf32>
    %11 = arith.addf %8, %10 : vector<8x128xf32>
    %c0_10 = arith.constant 0 : index
    %c0_11 = arith.constant 0 : index
    %12 = vector.load %arg6[%c0_10, %c0_11] : memref<8x128xf32, #tpu.memory_space<vmem>>, vector<8x128xf32>
    tpu.vector_store %arg6[%c0_10, %c0_11], %11 {strides = array<i32>} : memref<8x128xf32, #tpu.memory_space<vmem>>, vector<8x128xf32>,
    return
  }
  func.func @transform_0(%arg0: i32) -> (i32, i32) {
    %c0_i32 = arith.constant 0 : i32
    %c0_i32_0 = arith.constant 0 : i32
    return %arg0, %c0_i32 : i32, i32
  }
  func.func @transform_1(%arg0: i32) -> (i32, i32) {
    %c0_i32 = arith.constant 0 : i32
    %c0_i32_0 = arith.constant 0 : i32
    return %arg0, %c0_i32 : i32, i32
  }
  func.func @transform_2(%arg0: i32) -> (i32, i32) {
    %c0_i32 = arith.constant 0 : i32
    %c0_i32_0 = arith.constant 0 : i32
    %c0_i32_1 = arith.constant 0 : i32
    return %c0_i32, %c0_i32_0 : i32, i32
  }
  func.func @transform_3(%arg0: i32) -> (i32, i32) {
    %c0_i32 = arith.constant 0 : i32
    %c0_i32_0 = arith.constant 0 : i32
    %c0_i32_1 = arith.constant 0 : i32
    return %c0_i32, %c0_i32_0 : i32, i32
  }
  func.func @transform_4(%arg0: i32) -> (i32, i32) {
    %c0_i32 = arith.constant 0 : i32
    %c0_i32_0 = arith.constant 0 : i32
    %c0_i32_1 = arith.constant 0 : i32
    return %c0_i32, %c0_i32_0 : i32, i32
  }
  func.func @transform_5(%arg0: i32) -> (i32, i32) {
    %c0_i32 = arith.constant 0 : i32
    %c0_i32_0 = arith.constant 0 : i32
    return %arg0, %c0_i32 : i32, i32
  }
}

</mosaic_0001>

<bundles_post_ra>
// kernel: globalnet_forward.1
= control target key start
LH: loop header
LB: loop body
LE: loop exit
PB: predicated region body
PF: predicated region fallthrough
CT: control target
= control target key end

     0   :  { %10 = vsyncpa [#allocation3], 0  ;;  %s576_s0 = inlined_call_operand.hbm [shape: f32[8,128], index: 0, kind: input, shape index: {}]   ;;  %s577_s1 = inlined_call_operand.hbm [shape: f32[8,128], index: 1, kind: input, shape index: {}]   ;;  %s578_s2 = inlined_call_operand.hbm [shape: bf16[128,128], index: 2, kind: input, shape index: {}]   ;;  %s579_s3 = inlined_call_operand.hbm [shape: bf16[128,128], index: 3, kind: input, shape index: {}]   ;;  %s580_s4 = inlined_call_operand.vmem [shape: f32[1,128], index: 4, kind: input, shape index: {}]   ;;  %s581_s5 = inlined_call_operand.hbm [shape: f32[8,128], index: 5, kind: output, shape index: {}]  }
   0x1   :  { %11 = vsyncpa [#allocation6], 0 }
   0x2   :  { %12 = vsyncpa [#allocation9], 0 }
   0x3   :  { %13 = vsyncpa [#allocation4], 0  ;;  %s519_s18 = smov [#allocation5]   ;;  %s520_s20 = smov [#allocation2]  }
   0x4   :  { %s30_s19 = sshll.u32 %s519_s18, 4  ;;  %s20_s21 = sshll.u32 %s520_s20, 4  ;;  %s31_s19 = int_to_ptr.vmem [resolvable:$true] %s30_s19  ;;  %s21_s21 = int_to_ptr.vmem [resolvable:$true] %s20_s21 }
   0x5   :  { %s419_s22 = scalar_lea.vmem %s31_s19, 128  ;;  %p424_p1 = scmp.lt.s32.totalorder %s31_s19, %s31_s19 }
   0x6   :  { %p420_p0 = scmp.ne.s32.totalorder %s31_s19, %s419_s22  ;;  %p425_p2 = scmp.lt.s32.totalorder %s419_s22, %s419_s22 }
   0x8   :  { %p426_p3 = por %p425_p2, %p424_p1 }
   0xa   :  { %p427_p4 = pnand %p426_p3, %p420_p0 }
   0xc   :  { %430 = shalt.err (!%p427_p4)
}
   0xd   :  { %33 = dma.hbm_to_vmem [thread:$0]  %s577_s1, 128, %s31_s19, [#allocation6]  }
   0xe   :  { %s439_s25 = scalar_lea.vmem %s21_s21, 128  ;;  %p444_p6 = scmp.lt.s32.totalorder %s21_s21, %s21_s21 }
   0xf   :  { %p440_p5 = scmp.ne.s32.totalorder %s21_s21, %s439_s25  ;;  %p445_p7 = scmp.lt.s32.totalorder %s439_s25, %s439_s25 }
  0x11   :  { %p446_p8 = por %p445_p7, %p444_p6 }
  0x13   :  { %p447_p9 = pnand %p446_p8, %p440_p5 }
  0x15   :  { %450 = shalt.err (!%p447_p9)
}
  0x16   :  { %23 = dma.hbm_to_vmem [thread:$0]  %s576_s0, 128, %s21_s21, [#allocation3]  }
  0x17   :  { %s521_s28 = smov [#allocation7]  }
  0x18   :  { %s39_s29 = sshll.u32 %s521_s28, 4  ;;  %s40_s29 = int_to_ptr.vmem [resolvable:$true] %s39_s29 }
  0x19   :  { %s459_s30 = scalar_lea.vmem %s40_s29, 1024  ;;  %p464_p11 = scmp.lt.s32.totalorder %s40_s29, %s40_s29 }
  0x1a   :  { %p460_p10 = scmp.ne.s32.totalorder %s40_s29, %s459_s30  ;;  %p465_p12 = scmp.lt.s32.totalorder %s459_s30, %s459_s30 }
  0x1c   :  { %p466_p13 = por %p465_p12, %p464_p11 }
  0x1e   :  { %p467_p0 = pnand %p466_p13, %p460_p10 }
  0x20   :  { %470 = shalt.err (!%p467_p0)
}
  0x21   :  { %s522_s1 = smov 64   ;;  %s523_s6 = smov 4  }
  0x22   :  { %45 = dma.hbm_to_vmem [thread:$0]  %s578_s2, 1024, %s40_s29, [#allocation6], %s522_s1, %s522_s1, %s523_s6  }
  0x23   :  { %s524_s9 = smov [#allocation8]  }
  0x24   :  { %s51_s10 = sshll.u32 %s524_s9, 4  ;;  %s52_s10 = int_to_ptr.vmem [resolvable:$true] %s51_s10 }
  0x25   :  { %s479_s0 = scalar_lea.vmem %s52_s10, 1024  ;;  %p484_p2 = scmp.lt.s32.totalorder %s52_s10, %s52_s10 }
  0x26   :  { %p480_p1 = scmp.ne.s32.totalorder %s52_s10, %s479_s0  ;;  %p485_p3 = scmp.lt.s32.totalorder %s479_s0, %s479_s0 }
  0x28   :  { %p486_p4 = por %p485_p3, %p484_p2 }
  0x2a   :  { %p487_p5 = pnand %p486_p4, %p480_p1 }
  0x2c   :  { %490 = shalt.err (!%p487_p5)
}
  0x2d   :  { %57 = dma.hbm_to_vmem [thread:$0]  %s579_s3, 1024, %s52_s10, [#allocation9], %s522_s1, %s522_s1, %s523_s6  }
  0x2e   :  { %511 = dma.done.wait [#allocation3], 128  }
  0x2f   :  { %512 = vsyncadd [#allocation3], 4294967168 }
  0x30   :  { %513 = dma.done.wait [#allocation6], 1152  }
  0x31   :  { %514 = vsyncadd [#allocation6], 4294966144 }
  0x32   :  { %515 = dma.done.wait [#allocation9], 1024  }
  0x33   :  { %516 = vsyncadd [#allocation9], 4294966272  ;;  %v525_v0 = vmov 0.0   ;;  %vm526_vm0 = vmmov 0   ;;  %v395_v1 = vld [vmem:[#allocation8 + $0x38] sm:$0xff]   ;;  %v397_v3 = vld [vmem:[#allocation8 + $0x30] sm:$0xff]  }
  0x34   :  { %346 = vmatprep.subr.bf16.mxu0 %v525_v0  ;;  %366 = vmatprep.subr.bf16.mxu1 %v525_v0  ;;  %v396_v2 = vld [vmem:[#allocation7 + $0x38] sm:$0xff]   ;;  %v398_v4 = vld [vmem:[#allocation7 + $0x30] sm:$0xff]   ;;  %v399_v5 = vld [vmem:[#allocation8 + $0x28] sm:$0xff]   ;;  %s527_s13 = smov [#allocation10]  }
  0x35   :  { %362 = vmatprep.mubr.msk.bf16.mxu0 %vm526_vm0, %v525_v0  ;;  %382 = vmatprep.mubr.msk.bf16.mxu1 %vm526_vm0, %v525_v0  ;;  %v400_v6 = vld [vmem:[#allocation7 + $0x28] sm:$0xff]   ;;  %v401_v7 = vld [vmem:[#allocation8 + $0x20] sm:$0xff]   ;;  %v403_v9 = vld [vmem:[#allocation8 + $0x18] sm:$0xff]   ;;  %s300_s14 = sshll.u32 %s527_s13, 4  ;;  %s301_s14 = int_to_ptr.vmem [resolvable:$true] %s300_s14 }
  0x36   :  { %347 = vmatpush3.bf16.msra.mxu0 %v395_v1  ;;  %367 = vmatpush3.bf16.msra.mxu1 %v396_v2  ;;  %v402_v8 = vld [vmem:[#allocation7 + $0x20] sm:$0xff]   ;;  %v404_v10 = vld [vmem:[#allocation7 + $0x18] sm:$0xff]   ;;  %v405_v11 = vld [vmem:[#allocation8 + $0x10] sm:$0xff]   ;;  %s491_s15 = scalar_lea.vmem %s301_s14, 128  ;;  %p496_p7 = scmp.lt.s32.totalorder %s301_s14, %s301_s14 }
  0x37   :  { %348 = vmatprep.subr.bf16.mxu0 %v525_v0  ;;  %368 = vmatprep.subr.bf16.mxu1 %v525_v0  ;;  %v406_v12 = vld [vmem:[#allocation7 + $0x10] sm:$0xff]   ;;  %v407_v13 = vld [vmem:[#allocation8 + $0x8] sm:$0xff]   ;;  %v409_v15 = vld [vmem:[#allocation8] sm:$0xff]   ;;  %p492_p6 = scmp.ne.s32.totalorder %s301_s14, %s491_s15  ;;  %p497_p8 = scmp.lt.s32.totalorder %s491_s15, %s491_s15 }
  0x38   :  { %v408_v14 = vld [vmem:[#allocation7 + $0x8] sm:$0xff]   ;;  %v91_v16 = vld [vmem:[#allocation5] sm:$0xff]  ;;  %v410_v17 = vld [vmem:[#allocation7] sm:$0xff]  }
  0x39   :  { %v73_v18 = vld [vmem:[#allocation2] sm:$0xff]  ;;  %v92_v19 = vpack.c.bf16 %v91_v16, %v91_v16  ;;  %p498_p9 = por %p497_p8, %p496_p7 }
  0x3a   :  { %349 = vmatpush3.bf16.msra.mxu0 %v397_v3  ;;  %369 = vmatpush3.bf16.msra.mxu1 %v398_v4  ;;  %v74_v20 = vpack.c.bf16 %v73_v18, %v73_v18  ;;  %v327_v23 = vld [vmem:[%s580_s4] ss:$0 sm:$0xff] }
  0x3b   :  { %350 = vmatprep.subr.bf16.mxu0 %v525_v0  ;;  %370 = vmatprep.subr.bf16.mxu1 %v525_v0  ;;  %p499_p10 = pnand %p498_p9, %p492_p6 }
  0x3e   :  { %351 = vmatpush3.bf16.msra.mxu0 %v399_v5  ;;  %371 = vmatpush3.bf16.msra.mxu1 %v400_v6 }
  0x3f   :  { %352 = vmatprep.subr.bf16.mxu0 %v525_v0  ;;  %372 = vmatprep.subr.bf16.mxu1 %v525_v0 }
  0x42   :  { %353 = vmatpush3.bf16.msra.mxu0 %v401_v7  ;;  %373 = vmatpush3.bf16.msra.mxu1 %v402_v8 }
  0x43   :  { %354 = vmatprep.subr.bf16.mxu0 %v525_v0  ;;  %374 = vmatprep.subr.bf16.mxu1 %v525_v0 }
  0x46   :  { %355 = vmatpush3.bf16.msra.mxu0 %v403_v9  ;;  %375 = vmatpush3.bf16.msra.mxu1 %v404_v10 }
  0x47   :  { %356 = vmatprep.subr.bf16.mxu0 %v525_v0  ;;  %376 = vmatprep.subr.bf16.mxu1 %v525_v0 }
  0x4a   :  { %357 = vmatpush3.bf16.msra.mxu0 %v405_v11  ;;  %377 = vmatpush3.bf16.msra.mxu1 %v406_v12 }
  0x4b   :  { %358 = vmatprep.subr.bf16.mxu0 %v525_v0  ;;  %378 = vmatprep.subr.bf16.mxu1 %v525_v0 }
  0x4e   :  { %359 = vmatpush3.bf16.msra.mxu0 %v407_v13  ;;  %379 = vmatpush3.bf16.msra.mxu1 %v408_v14 }
  0x4f   :  { %360 = vmatprep.subr.bf16.mxu0 %v525_v0  ;;  %380 = vmatprep.subr.bf16.mxu1 %v525_v0 }
  0x52   :  { %361 = vmatpush3.bf16.msra.mxu0 %v409_v15  ;;  %381 = vmatpush3.bf16.msra.mxu1 %v410_v17 }
  0x55   :  { %363 = vmatmul.mubr.bf16.vlgmr.msra.gmra.mxu0 %v92_v19  ;;  %383 = vmatmul.mubr.bf16.vlgmr.msra.gmra.mxu1 %v74_v20 }
 0x115   :  { %v191_v21 = vpop.f32.mrf.mxu0  ;;  %v279_v22 = vpop.f32.mrf.mxu1 }
 0x116   :  { %v280_v24 = vadd.f32 %v279_v22, %v191_v21 }
 0x117   :  { %v364_v25 = vpop.f32.mrf.mxu0  ;;  %v384_v26 = vpop.f32.mrf.mxu1 }
 0x118   :  { %v292_v27 = vadd.f32 %v327_v23, %v280_v24 }
 0x119   :  { %v194_v28 = vpop.f32.mrf.mxu0  ;;  %v282_v29 = vpop.f32.mrf.mxu1 }
 0x11a   :  { %293 = vst [vmem:[#allocation10] sm:$0xff] %v292_v27 }
 0x11b   :  { %v365_v30 = vpop.f32.mrf.mxu0  ;;  %v385_v31 = vpop.f32.mrf.mxu1 }
 0x11c   :  { %502 = shalt.err (!%p499_p10)
}
 0x11d   :  { %303 = dma.vmem_to_hbm [thread:$0]  %s301_s14, 128, %s581_s5, [#allocation4]  }
 0x11e   :  { %517 = dma.done.wait [#allocation4], 128  }
 0x11f   :  { %518 = vsyncadd [#allocation4], 4294967168 }
 0x120   :  { %307 = vsyncpa [#allocation3], 1 }
 0x121   :  { %308 = vsyncpa [#allocation6], 1 }
 0x122   :  { %309 = vsyncpa [#allocation9], 1 }
 0x123   :  { %310 = vsyncpa [#allocation4], 1 }

</bundles_post_ra>
